<compile_context>
chip_gen: v7x
topology: tpu7x:2x2x1
jax: 0.10.0
libtpu: 0.0.40
codegen_flags: <defaults>
</compile_context>

<pallas_src>
import numpy as np
import jax
import jax.numpy as jnp
from jax.experimental import pallas as pl
from jax.experimental.pallas import tpu as pltpu

SCALE = 1.0 / 0.6              # ScaledSiLU scale factor
LANES = 128                    # TPU vreg lane width
SUBLANES = 8                   # f32 sublane count
WIDE_COLS = 8 * LANES          # 1024-lane slab for larger inputs
MIN_BLOCKS = 4                 # >= 2 pipelined blocks per TC on v7x


def _round_up(x, m):
    return (x + m - 1) // m * m


def _sublane_unit(dtype):
    # (sublane, 128) tiling unit is dtype dependent: 8 f32, 16 bf16, 32 int8/fp8.
    itemsize = jnp.dtype(dtype).itemsize
    return SUBLANES * max(1, 4 // itemsize)


def _target_block_bytes():
    # v7x (3.2 TB/s HBM) amortizes the ~0.35 us per-step overhead better with
    # bigger blocks; v5e must stay well under its 16 MiB default scoped VMEM.
    try:
        kind = jax.devices()[0].device_kind.lower()
    except Exception:
        kind = ""
    if ("v7" in kind) or ("7x" in kind):
        return 4 << 20
    return 2 << 20


def scaled_silu_kernel(x_ref, o_ref):
    # Compute in f32: no-op for f32 inputs, keeps bf16 inputs off v5e's
    # non-bf16 VPU/EUP paths. exp lowers to the EUP, mul/add to the VPU.
    x = x_ref[...].astype(jnp.float32)
    o_ref[...] = (x * jax.nn.sigmoid(x) * SCALE).astype(o_ref.dtype)


def _run_kernel(x2d, sub_unit):
    """Run the elementwise kernel over a lane-dense [rows, cols] slab."""
    rows, cols = x2d.shape
    dtype = x2d.dtype
    itemsize = jnp.dtype(dtype).itemsize

    bytes_per_row = cols * itemsize
    max_block_rows = max(
        sub_unit,
        (_target_block_bytes() // bytes_per_row) // sub_unit * sub_unit)

    if rows <= max_block_rows:
        # Single block spanning the full row extent (exempt from the
        # (sublane, 128) divisibility rule since it equals the array dim).
        block_rows = rows
    else:
        # Cap the block so the grid has >= MIN_BLOCKS blocks; the final block
        # may be partial — Pallas masks it, no element padding required.
        quarter = _round_up(pl.cdiv(rows, MIN_BLOCKS), sub_unit)
        block_rows = max(sub_unit, min(max_block_rows, quarter))
    grid = (pl.cdiv(rows, block_rows),)

    n_elems = rows * cols
    return pl.pallas_call(
        scaled_silu_kernel,
        out_shape=jax.ShapeDtypeStruct((rows, cols), dtype),
        grid=grid,
        in_specs=[pl.BlockSpec((block_rows, cols), lambda i: (i, 0))],
        out_specs=pl.BlockSpec((block_rows, cols), lambda i: (i, 0)),
        compiler_params=pltpu.CompilerParams(
            dimension_semantics=("parallel",)),   # shards across v7x's 2 TCs
        cost_estimate=pl.CostEstimate(
            flops=5 * n_elems,
            transcendentals=n_elems,
            bytes_accessed=2 * n_elems * itemsize),
    )(x2d)


def _scaled_silu_impl(x):
    orig_shape = x.shape
    orig_dtype = x.dtype
    n = x.size
    flat = x.reshape(-1)

    sub_unit = _sublane_unit(orig_dtype)
    cols = WIDE_COLS if n >= WIDE_COLS * sub_unit else LANES

    n_body = (n // cols) * cols
    tail = n - n_body

    if tail == 0:
        # Fully lane-aligned: reshape in/out is free, zero extra copies.
        out2d = _run_kernel(flat.reshape(n // cols, cols), sub_unit)
        return out2d.reshape(orig_shape)

    if n_body == 0:
        # Tiny input (< cols elements): pad to one (sub_unit, cols) block.
        padded = jnp.pad(flat, (0, sub_unit * cols - n)).reshape(sub_unit, cols)
        out = _run_kernel(padded, sub_unit)
        return out.reshape(-1)[:n].reshape(orig_shape)

    # Ragged: aligned body through the kernel, <cols-element tail via a tiny
    # XLA elementwise op (avoids padding + re-slicing the whole array).
    body = flat[:n_body].reshape(n_body // cols, cols)
    out_body = _run_kernel(body, sub_unit).reshape(-1)
    t = flat[n_body:].astype(jnp.float32)
    out_tail = (t * jax.nn.sigmoid(t) * SCALE).astype(orig_dtype)
    return jnp.concatenate([out_body, out_tail]).reshape(orig_shape)


scaled_silu = jax.jit(_scaled_silu_impl)


def reference(x):
    return jax.nn.silu(x) * SCALE


if __name__ == "__main__":
    key = jax.random.PRNGKey(0)
    k1, k2, k3 = jax.random.split(key, 3)

    # Small shape consistent with an activation module.
    x_main = jax.random.normal(k1, (2, 4, 16, 16), jnp.float32)
    # Ragged shape: exercises the aligned-body + tail path.
    x_ragged = jax.random.normal(k2, (3, 37, 50), jnp.float32)
    # Larger 2-D slab: exercises the wide (1024-lane) multi-block pipelined path.
    x_wide = jax.random.normal(k3, (1024, 1024), jnp.float32)

    for name, x in (("main", x_main), ("ragged", x_ragged), ("wide", x_wide)):
        y = scaled_silu(x)
        jax.block_until_ready(y)
        np.testing.assert_allclose(np.asarray(y), np.asarray(reference(x)),
                                   rtol=1e-5, atol=1e-6)

    print("KERNEL_OK")
</pallas_src>

<mosaic_0001>
module attributes {stable_mosaic.version = 11 : i64} {
  func.func @scaled_silu_kernel(%arg0: i32, %arg1: memref<16x128xf32, #tpu.memory_space<vmem>>, %arg2: memref<16x128xf32, #tpu.memory_space<vmem>>) attributes {dimension_semantics = [#tpu.dimension_semantics<parallel>], iteration_bounds = array<i64: 1>, scalar_prefetch = 0 : i64, scratch_operands = 0 : i64, tpu.core_type = #tpu.core_type<tc>, window_params = [{transform_indices = @transform_0, window_bounds = array<i64: 16, 128>}, {transform_indices = @transform_1, window_bounds = array<i64: 16, 128>}]} {
    %c0 = arith.constant 0 : index
    %c0_0 = arith.constant 0 : index
    %0 = vector.load %arg1[%c0, %c0_0] : memref<16x128xf32, #tpu.memory_space<vmem>>, vector<16x128xf32>
    %1 = arith.negf %0 : vector<16x128xf32>
    %2 = math.exp %1 : vector<16x128xf32>
    %cst = arith.constant 1.000000e+00 : f32
    %3 = vector.broadcast %cst : f32 to vector<16x128xf32>
    %4 = arith.addf %3, %2 : vector<16x128xf32>
    %5 = arith.divf %3, %4 : vector<16x128xf32>
    %6 = arith.mulf %0, %5 : vector<16x128xf32>
    %cst_1 = arith.constant 1.66666663 : f32
    %7 = vector.broadcast %cst_1 : f32 to vector<16x128xf32>
    %8 = arith.mulf %6, %7 : vector<16x128xf32>
    %c0_2 = arith.constant 0 : index
    %c0_3 = arith.constant 0 : index
    %9 = vector.load %arg2[%c0_2, %c0_3] : memref<16x128xf32, #tpu.memory_space<vmem>>, vector<16x128xf32>
    tpu.vector_store %arg2[%c0_2, %c0_3], %8 {strides = array<i32>} : memref<16x128xf32, #tpu.memory_space<vmem>>, vector<16x128xf32>,
    return
  }
  func.func @transform_0(%arg0: i32) -> (i32, i32) {
    %c0_i32 = arith.constant 0 : i32
    %c0_i32_0 = arith.constant 0 : i32
    return %arg0, %c0_i32 : i32, i32
  }
  func.func @transform_1(%arg0: i32) -> (i32, i32) {
    %c0_i32 = arith.constant 0 : i32
    %c0_i32_0 = arith.constant 0 : i32
    return %arg0, %c0_i32 : i32, i32
  }
}

</mosaic_0001>

<bundles_post_ra>
// kernel: _scaled_silu_impl.1
= control target key start
LH: loop header
LB: loop body
LE: loop exit
PB: predicated region body
PF: predicated region fallthrough
CT: control target
= control target key end

     0   :  { %s64_s0 = inlined_call_operand.vmem [shape: f32[16,128], index: 0, kind: input, shape index: {}]   ;;  %s65_s1 = inlined_call_operand.vmem [shape: f32[16,128], index: 1, kind: output, shape index: {}]  }
   0x1   :  { %v8_v0 = vld [vmem:[%s64_s0] sm:$0xff]  ;;  %v9_v1 = vld [vmem:[%s64_s0 + $0x8] sm:$0xff] }
   0x2   :  { %v32_v2 = vmul.f32 -1.442695, %v8_v0  ;;  %v33_v3 = vmul.f32 -1.442695, %v9_v1 }
   0x4   :  { %34 = vpow2.f32 %v32_v2 }
   0x5   :  { %36 = vpow2.f32 %v33_v3 }
   0xe   :  { %v35_v4 = vpop.eup %34 }
   0xf   :  { %v37_v5 = vpop.eup %36  ;;  %v16_v6 = vadd.f32 1.0, %v35_v4 }
  0x10   :  { %v17_v7 = vadd.f32 1.0, %v37_v5 }
  0x11   :  { %38 = vrcp.f32 %v16_v6 }
  0x12   :  { %40 = vrcp.f32 %v17_v7 }
  0x1b   :  { %v39_v8 = vpop.eup %38 }
  0x1c   :  { %v41_v9 = vpop.eup %40  ;;  %v22_v10 = vmul.f32 %v39_v8, %v8_v0 }
  0x1d   :  { %v23_v11 = vmul.f32 %v41_v9, %v9_v1 }
  0x1e   :  { %v24_v12 = vmul.f32 1.6666666, %v22_v10 }
  0x1f   :  { %v25_v13 = vmul.f32 1.6666666, %v23_v11 }
  0x20   :  { %26 = vst [vmem:[%s65_s1] sm:$0xff] %v24_v12 }
  0x21   :  { %27 = vst [vmem:[%s65_s1 + $0x8] sm:$0xff] %v25_v13 }

</bundles_post_ra>
